<compile_context>
chip_gen: v6e
topology: v6e:2x2x1
jax: 0.10.0
libtpu: 0.0.40
codegen_flags: <defaults>
</compile_context>

<pallas_src>
import math

import jax
import jax.numpy as jnp
from jax.experimental import pallas as pl
from jax.experimental.pallas import tpu as pltpu


def _round_up(x, m):
    return ((x + m - 1) // m) * m


def ffn_kernel(x_ref, w1_ref, b1_ref, w2_ref, b2_ref, o_ref, acc_ref):
    # x_ref:  (TILE_M, d_model)   bf16
    # w1_ref: (d_model, TILE_H)   bf16      b1_ref: (1, TILE_H)  f32
    # w2_ref: (TILE_H, d_model)   bf16      b2_ref: (1, d_model) f32
    # o_ref:  (TILE_M, d_model)             acc_ref: (TILE_M, d_model) f32
    j = pl.program_id(1)

    @pl.when(j == 0)
    def _():
        acc_ref[...] = jnp.zeros_like(acc_ref)

    # linear1 chunk on the MXU (bf16 in, f32 accumulate).
    h = jnp.dot(x_ref[...], w1_ref[...], preferred_element_type=jnp.float32)
    # bias + ReLU in f32 on the VPU.
    h = jnp.maximum(h + b1_ref[...], 0.0)
    # dropout1: identity (eval mode).
    # linear2 partial product, accumulated over d_hidden chunks in f32.
    acc_ref[...] += jnp.dot(h.astype(w2_ref.dtype), w2_ref[...],
                            preferred_element_type=jnp.float32)

    @pl.when(j == pl.num_programs(1) - 1)
    def _():
        # dropout2: identity (eval mode).
        o_ref[...] = (acc_ref[...] + b2_ref[...]).astype(o_ref.dtype)


def feed_forward_nn(x, w1, b1, w2, b2, *, tile_m=512, tile_h=512,
                    mxu_dtype=jnp.bfloat16):
    """x: [batch, seq, d_model] -> [batch, seq, d_model].

    w1: (d_model, d_hidden)  b1: (d_hidden,)
    w2: (d_hidden, d_model)  b2: (d_model,)
    Weights are (in, out), i.e. PyTorch's linear.weight.T.
    For best performance d_model should be a multiple of 128 (lane-dense).
    """
    batch, seq, d_model = x.shape
    d_hidden = w1.shape[1]
    out_dtype = x.dtype

    m = batch * seq
    x2d = x.reshape(m, d_model)

    # --- tiling (multiples of 8 sublanes / 128 lanes) ---------------------
    tile_m = _round_up(max(8, min(tile_m, m)), 8)
    m_pad = _round_up(m, tile_m)
    tile_h = _round_up(max(128, min(tile_h, d_hidden)), 128)
    h_pad = _round_up(d_hidden, tile_h)

    # --- dtype plumbing: bf16 MXU operands, f32 biases --------------------
    x2d = x2d.astype(mxu_dtype)
    w1 = w1.astype(mxu_dtype)
    w2 = w2.astype(mxu_dtype)
    b1 = b1.reshape(1, d_hidden).astype(jnp.float32)
    b2 = b2.reshape(1, d_model).astype(jnp.float32)

    # --- padding (zero-padded hidden units contribute exactly 0) ----------
    if m_pad != m:
        x2d = jnp.pad(x2d, ((0, m_pad - m), (0, 0)))
    if h_pad != d_hidden:
        w1 = jnp.pad(w1, ((0, 0), (0, h_pad - d_hidden)))
        b1 = jnp.pad(b1, ((0, 0), (0, h_pad - d_hidden)))
        w2 = jnp.pad(w2, ((0, h_pad - d_hidden), (0, 0)))

    grid = (m_pad // tile_m, h_pad // tile_h)

    # --- VMEM budget + cost estimate --------------------------------------
    itm = jnp.dtype(mxu_dtype).itemsize
    out_itm = jnp.dtype(out_dtype).itemsize
    vmem_bytes = (
        2 * tile_m * d_model * itm            # x tiles (double-buffered)
        + 2 * d_model * tile_h * itm          # W1 tiles
        + 2 * tile_h * d_model * itm          # W2 tiles
        + 2 * tile_h * 4 + 2 * d_model * 4    # bias tiles
        + 2 * tile_m * d_model * out_itm      # out tiles
        + tile_m * d_model * 4)               # f32 accumulator scratch
    vmem_limit = min(max(int(vmem_bytes * 1.5), 32 * 1024 * 1024),
                     64 * 1024 * 1024)        # fits v7x's 64 MiB / TC

    bytes_accessed = (x2d.size * itm + w1.size * itm + w2.size * itm
                      + b1.size * 4 + b2.size * 4
                      + m_pad * d_model * out_itm)
    cost = pl.CostEstimate(flops=4 * m_pad * d_model * h_pad,
                           transcendentals=0,
                           bytes_accessed=bytes_accessed)

    out2d = pl.pallas_call(
        ffn_kernel,
        out_shape=jax.ShapeDtypeStruct((m_pad, d_model), out_dtype),
        grid_spec=pltpu.PrefetchScalarGridSpec(
            num_scalar_prefetch=0,
            grid=grid,
            in_specs=[
                pl.BlockSpec((tile_m, d_model), lambda i, j: (i, 0)),   # x
                pl.BlockSpec((d_model, tile_h), lambda i, j: (0, j)),   # W1
                pl.BlockSpec((1, tile_h), lambda i, j: (0, j)),         # b1
                pl.BlockSpec((tile_h, d_model), lambda i, j: (j, 0)),   # W2
                pl.BlockSpec((1, d_model), lambda i, j: (0, 0)),        # b2
            ],
            out_specs=pl.BlockSpec((tile_m, d_model), lambda i, j: (i, 0)),
            scratch_shapes=[pltpu.VMEM((tile_m, d_model), jnp.float32)],
        ),
        compiler_params=pltpu.CompilerParams(
            dimension_semantics=("parallel", "arbitrary"),
            vmem_limit_bytes=vmem_limit),
        cost_estimate=cost,
    )(x2d, w1, b1, w2, b2)

    return out2d[:m].reshape(batch, seq, d_model)


def xavier_uniform(key, fan_in, fan_out, dtype=jnp.float32):
    # Matches torch.nn.init.xavier_uniform_ bound; returned as (in, out).
    bound = math.sqrt(6.0 / (fan_in + fan_out))
    return jax.random.uniform(key, (fan_in, fan_out), dtype=dtype,
                              minval=-bound, maxval=bound)


if __name__ == "__main__":
    batch, seq = 2, 128
    d_model, d_hidden = 128, 512   # 128-aligned -> lane-dense, full MXU tiles

    key = jax.random.PRNGKey(0)
    kx, k1, k2 = jax.random.split(key, 3)

    x = jax.random.normal(kx, (batch, seq, d_model), dtype=jnp.float32)
    w1 = xavier_uniform(k1, d_model, d_hidden)        # linear1.weight.T
    b1 = jnp.zeros((d_hidden,), dtype=jnp.float32)    # linear1.bias
    w2 = xavier_uniform(k2, d_hidden, d_model)        # linear2.weight.T
    b2 = jnp.zeros((d_model,), dtype=jnp.float32)     # linear2.bias

    # tile_m=128 / tile_h=256 -> 2x2 grid so both axes (pipelining + hidden
    # accumulation) are exercised even at this small demo size.
    out = feed_forward_nn(x, w1, b1, w2, b2, tile_m=128, tile_h=256)
    jax.block_until_ready(out)

    # Pure-JAX reference mirroring the kernel's dtype path (bf16 MXU inputs,
    # f32 accumulation, eval-mode dropout == identity).
    xb = x.reshape(-1, d_model).astype(jnp.bfloat16)
    w1b = w1.astype(jnp.bfloat16)
    w2b = w2.astype(jnp.bfloat16)
    h_ref = jnp.maximum(
        jnp.dot(xb, w1b, preferred_element_type=jnp.float32) + b1, 0.0)
    ref = jnp.dot(h_ref.astype(jnp.bfloat16), w2b,
                  preferred_element_type=jnp.float32) + b2
    ref = ref.astype(x.dtype).reshape(batch, seq, d_model)

    assert jnp.allclose(out, ref, atol=1e-2, rtol=1e-2), (
        float(jnp.max(jnp.abs(out - ref))))
    print("KERNEL_OK")
</pallas_src>

<mosaic_0001>
module attributes {stable_mosaic.version = 11 : i64} {
  func.func @ffn_kernel(%arg0: i32, %arg1: i32, %arg2: memref<128x128xbf16, #tpu.memory_space<vmem>>, %arg3: memref<128x256xbf16, #tpu.memory_space<vmem>>, %arg4: memref<1x256xf32, #tpu.memory_space<vmem>>, %arg5: memref<256x128xbf16, #tpu.memory_space<vmem>>, %arg6: memref<1x128xf32, #tpu.memory_space<vmem>>, %arg7: memref<128x128xf32, #tpu.memory_space<vmem>>, %arg8: memref<128x128xf32, #tpu.memory_space<vmem>>) attributes {dimension_semantics = [#tpu.dimension_semantics<parallel>, #tpu.dimension_semantics<arbitrary>], iteration_bounds = array<i64: 2, 2>, scalar_prefetch = 0 : i64, scratch_operands = 1 : i64, tpu.core_type = #tpu.core_type<tc>, window_params = [{transform_indices = @transform_0, window_bounds = array<i64: 128, 128>}, {transform_indices = @transform_1, window_bounds = array<i64: 128, 256>}, {transform_indices = @transform_2, window_bounds = array<i64: 1, 256>}, {transform_indices = @transform_3, window_bounds = array<i64: 256, 128>}, {pipeline_mode = #tpu.pipeline_mode<synchronous>, transform_indices = @transform_4, window_bounds = array<i64: 1, 128>}, {transform_indices = @transform_5, window_bounds = array<i64: 128, 128>}]} {
    %c0_i32 = arith.constant 0 : i32
    %0 = arith.cmpi eq, %arg1, %c0_i32 : i32
    %1 = arith.extui %0 : i1 to i32
    %c0_i32_0 = arith.constant 0 : i32
    %2 = arith.cmpi ne, %1, %c0_i32_0 : i32
    scf.if %2 {
      %cst_15 = arith.constant 0.000000e+00 : f32
      %20 = vector.broadcast %cst_15 : f32 to vector<128x128xf32>
      %c0_16 = arith.constant 0 : index
      %c0_17 = arith.constant 0 : index
      %21 = vector.load %arg8[%c0_16, %c0_17] : memref<128x128xf32, #tpu.memory_space<vmem>>, vector<128x128xf32>
      tpu.vector_store %arg8[%c0_16, %c0_17], %20 {strides = array<i32>} : memref<128x128xf32, #tpu.memory_space<vmem>>, vector<128x128xf32>,
    } else {
    }
    %c0 = arith.constant 0 : index
    %c0_1 = arith.constant 0 : index
    %3 = vector.load %arg2[%c0, %c0_1] : memref<128x128xbf16, #tpu.memory_space<vmem>>, vector<128x128xbf16>
    %c0_2 = arith.constant 0 : index
    %c0_3 = arith.constant 0 : index
    %4 = vector.load %arg3[%c0_2, %c0_3] : memref<128x256xbf16, #tpu.memory_space<vmem>>, vector<128x256xbf16>
    %cst = arith.constant dense<0.000000e+00> : vector<128x256xf32>
    %5 = tpu.matmul %3, %4, %cst {dimension_numbers = #tpu.dot_dimension_numbers<[1], [0], [0], [1], [0, 0, 1, 1], [], []>} : vector<128x128xbf16>, vector<128x256xbf16>, vector<128x256xf32> -> vector<128x256xf32>
    %c0_4 = arith.constant 0 : index
    %c0_5 = arith.constant 0 : index
    %6 = vector.load %arg4[%c0_4, %c0_5] : memref<1x256xf32, #tpu.memory_space<vmem>>, vector<1x256xf32>
    %7 = vector.broadcast %6 : vector<1x256xf32> to vector<128x256xf32>
    %8 = arith.addf %5, %7 : vector<128x256xf32>
    %cst_6 = arith.constant 0.000000e+00 : f32
    %9 = vector.broadcast %cst_6 : f32 to vector<128x256xf32>
    %10 = arith.maximumf %8, %9 : vector<128x256xf32>
    %c0_7 = arith.constant 0 : index
    %c0_8 = arith.constant 0 : index
    %11 = vector.load %arg8[%c0_7, %c0_8] : memref<128x128xf32, #tpu.memory_space<vmem>>, vector<128x128xf32>
    %12 = arith.truncf %10 : vector<128x256xf32> to vector<128x256xbf16>
    %c0_9 = arith.constant 0 : index
    %c0_10 = arith.constant 0 : index
    %13 = vector.load %arg5[%c0_9, %c0_10] : memref<256x128xbf16, #tpu.memory_space<vmem>>, vector<256x128xbf16>
    %cst_11 = arith.constant dense<0.000000e+00> : vector<128x128xf32>
    %14 = tpu.matmul %12, %13, %cst_11 {dimension_numbers = #tpu.dot_dimension_numbers<[1], [0], [0], [1], [0, 0, 1, 1], [], []>} : vector<128x256xbf16>, vector<256x128xbf16>, vector<128x128xf32> -> vector<128x128xf32>
    %15 = arith.addf %11, %14 : vector<128x128xf32>
    %c0_12 = arith.constant 0 : index
    %c0_13 = arith.constant 0 : index
    %16 = vector.load %arg8[%c0_12, %c0_13] : memref<128x128xf32, #tpu.memory_space<vmem>>, vector<128x128xf32>
    tpu.vector_store %arg8[%c0_12, %c0_13], %15 {strides = array<i32>} : memref<128x128xf32, #tpu.memory_space<vmem>>, vector<128x128xf32>,
    %c1_i32 = arith.constant 1 : i32
    %17 = arith.cmpi eq, %arg1, %c1_i32 : i32
    %18 = arith.extui %17 : i1 to i32
    %c0_i32_14 = arith.constant 0 : i32
    %19 = arith.cmpi ne, %18, %c0_i32_14 : i32
    scf.if %19 {
      %c0_15 = arith.constant 0 : index
      %c0_16 = arith.constant 0 : index
      %20 = vector.load %arg8[%c0_15, %c0_16] : memref<128x128xf32, #tpu.memory_space<vmem>>, vector<128x128xf32>
      %c0_17 = arith.constant 0 : index
      %c0_18 = arith.constant 0 : index
      %21 = vector.load %arg6[%c0_17, %c0_18] : memref<1x128xf32, #tpu.memory_space<vmem>>, vector<1x128xf32>
      %22 = vector.broadcast %21 : vector<1x128xf32> to vector<128x128xf32>
      %23 = arith.addf %20, %22 : vector<128x128xf32>
      %c0_19 = arith.constant 0 : index
      %c0_20 = arith.constant 0 : index
      %24 = vector.load %arg7[%c0_19, %c0_20] : memref<128x128xf32, #tpu.memory_space<vmem>>, vector<128x128xf32>
      tpu.vector_store %arg7[%c0_19, %c0_20], %23 {strides = array<i32>} : memref<128x128xf32, #tpu.memory_space<vmem>>, vector<128x128xf32>,
    } else {
    }
    return
  }
  func.func @transform_0(%arg0: i32, %arg1: i32) -> (i32, i32) {
    %c0_i32 = arith.constant 0 : i32
    %c0_i32_0 = arith.constant 0 : i32
    return %arg0, %c0_i32 : i32, i32
  }
  func.func @transform_1(%arg0: i32, %arg1: i32) -> (i32, i32) {
    %c0_i32 = arith.constant 0 : i32
    %c0_i32_0 = arith.constant 0 : i32
    return %c0_i32, %arg1 : i32, i32
  }
  func.func @transform_2(%arg0: i32, %arg1: i32) -> (i32, i32) {
    %c0_i32 = arith.constant 0 : i32
    %c0_i32_0 = arith.constant 0 : i32
    return %c0_i32, %arg1 : i32, i32
  }
  func.func @transform_3(%arg0: i32, %arg1: i32) -> (i32, i32) {
    %c0_i32 = arith.constant 0 : i32
    %c0_i32_0 = arith.constant 0 : i32
    return %arg1, %c0_i32 : i32, i32
  }
  func.func @transform_4(%arg0: i32, %arg1: i32) -> (i32, i32) {
    %c0_i32 = arith.constant 0 : i32
    %c0_i32_0 = arith.constant 0 : i32
    %c0_i32_1 = arith.constant 0 : i32
    return %c0_i32, %c0_i32_0 : i32, i32
  }
  func.func @transform_5(%arg0: i32, %arg1: i32) -> (i32, i32) {
    %c0_i32 = arith.constant 0 : i32
    %c0_i32_0 = arith.constant 0 : i32
    return %arg0, %c0_i32 : i32, i32
  }
}

</mosaic_0001>

<bundles_post_ra>
// kernel: tpu_custom_call.1
= control target key start
LH: loop header
LB: loop body
LE: loop exit
PB: predicated region body
PF: predicated region fallthrough
CT: control target
= control target key end

     0   :  { %s2243_s0 = inlined_call_operand.hbm [shape: bf16[256,128], index: 0, kind: input, shape index: {}]   ;;  %s2244_s1 = inlined_call_operand.hbm [shape: bf16[128,512], index: 1, kind: input, shape index: {}]   ;;  %s2245_s2 = inlined_call_operand.hbm [shape: f32[1,512], index: 2, kind: input, shape index: {}]   ;;  %s2246_s3 = inlined_call_operand.hbm [shape: bf16[512,128], index: 3, kind: input, shape index: {}]   ;;  %s2247_s4 = inlined_call_operand.vmem [shape: f32[1,128], index: 4, kind: input, shape index: {}]   ;;  %s2248_s5 = inlined_call_operand.hbm [shape: f32[256,128], index: 5, kind: output, shape index: {}]  }
   0x1   :  { %2261 = sst [smem:[#allocation26_spill]] %s2243_s0 }
   0x2   :  { %2262 = sst [smem:[#allocation27_spill]] %s2244_s1 }
   0x3   :  { %2263 = sst [smem:[#allocation28_spill]] %s2247_s4 }
   0x4   :  { %2264 = sst [smem:[#allocation29_spill]] %s2248_s5 }
   0x5   :  { %10 = vsyncpa [#allocation4], 0 }
   0x6   :  { %12 = vsyncpa [#allocation4 + $0x1], 0 }
   0x7   :  { %13 = vsyncpa [#allocation7], 0 }
   0x8   :  { %15 = vsyncpa [#allocation7 + $0x1], 0 }
   0x9   :  { %16 = vsyncpa [#allocation10], 0 }
   0xa   :  { %18 = vsyncpa [#allocation10 + $0x1], 0 }
   0xb   :  { %19 = vsyncpa [#allocation5], 0 }
   0xc   :  { %21 = vsyncpa [#allocation5 + $0x1], 0  ;;  %s1824_s18 = smov 0   ;;  %s1826_s19 = smov 0  }
   0xd   :  { %s1828_s20 = smov 0   ;;  %s1830_s21 = smov 0  }
   0xe   :  { %s1832_s22 = smov 0   ;;  %s1834_s23 = smov 0  }
   0xf   :  { %s1836_s24 = smov 0   ;;  %s1838_s25 = smov 0  }
  0x10   :  { %s1840_s26 = smov 0   ;;  %s1842_s27 = smov 0  }
  0x11   :  { %s1844_s28 = smov 0  }
  0x12 LB: > { %2265 = sst [smem:[#allocation16_spill]] %s1746_s20  ;;  %p54_p0 = scmp.eq.s32.totalorder %s1778_s28, 0  ;;  %s1778_s28 = sphi %s1844_s28, %s27_s28   ;;  %s1774_s27 = sphi %s1842_s27, %s2302_s27   ;;  %s1770_s26 = sphi %s1840_s26, %s2309_s26   ;;  %s1766_s25 = sphi %s1838_s25, %s2308_s25   ;;  %s1762_s24 = sphi %s1836_s24, %s2307_s24   ;;  %s1758_s23 = sphi %s1834_s23, %s2299_s23   ;;  %s1754_s22 = sphi %s1832_s22, %s2306_s22   ;;  %s1750_s21 = sphi %s1830_s21, %s2305_s21   ;;  %s1746_s20 = sphi %s1828_s20, %s2297_s20   ;;  %s1742_s19 = sphi %s1826_s19, %s2304_s19   ;;  %s1738_s18 = sphi %s1824_s18, %s2303_s18  }
  0x13   : > { %2266 = sst [smem:[#allocation17_spill]] %s1750_s21  ;;  %s72_s29 = sadd.s32 1, %s1746_s20 }
  0x14   : > { %2267 = sst [smem:[#allocation18_spill]] %s1758_s23  ;;  %p79_p1 = scmp.ne.s32.totalorder %s1746_s20, %s1742_s19 }
  0x15   : > { %2268 = sst [smem:[#allocation19_spill]] %s1766_s25  ;;  %p85_p2 = scmp.ne.s32.totalorder %s1742_s19, %s1738_s18 }
  0x16   : > { %2269 = sst [smem:[#allocation20_spill]] %s1774_s27  ;;  %p2252_p3 = scmp.lt.s32.totalorder %s1778_s28, 4 }
  0x17   : > { %p81_p4 = por %p79_p1, %p54_p0  ;;  %s232_s30 = sand.u32 1, %s1778_s28  }
  0x18   : > { %s1890_s6 = sand.u32 1, %s1746_s20   ;;  %s1296_s8 = sshll.u32 %s1770_s26, 7 }
  0x19   : > { %s2249_s7 = sshll.u32 %s1890_s6, 7  ;;  %s2270_s1 = sld [smem:[#allocation27_spill]] }
  0x1a   : > { %s236_s12 = scalar_lea.vmem [#allocation6], %s2249_s7  ;;  %p1901_p5 = pnand %p2252_p3, %p81_p4 }
  0x1b   : > { %s243_s13 = sshll.u32 %s236_s12, 4  ;;  %p1241_p6 = scmp.ge.s32.totalorder %s1778_s28, 1  ;;  %s244_s13 = int_to_ptr.vmem [resolvable:$true] %s243_s13 }
  0x1c   : > { %s1906_s15 = scalar_lea.sflag [#allocation7], %s232_s30  ;;  %p2251_p7 = pneg %p1901_p5 }
  0x1d   : > { %s1551_s16 = scalar_lea.vmem %s244_s13, 2048  ;;  %s1780_s17 = smov [#allocation6]  }
  0x1e   : > { %p1552_p8 = scmp.ne.s32.totalorder %s244_s13, %s1551_s16 }
  0x1f   : > { %s242_s11 = scalar_lea.hbm %s2270_s1, %s1296_s8  ;;  %s1556_s8 = sshll.u32 %s1780_s17, 4  ;;  %s1557_s8 = int_to_ptr.vmem [resolvable:$false] %s1556_s8 }
  0x20   : > { %p1554_p9 = pnand %p1552_p8, %p2251_p7  ;;  %s1558_s9 = scalar_lea.vmem %s1557_s8, 4096 }
  0x21   : > { %p1559_p11 = scmp.lt.s32.totalorder %s244_s13, %s1557_s8  ;;  %p1560_p12 = scmp.lt.s32.totalorder %s1558_s9, %s1551_s16 }
  0x22   : > { %p1555_p10 = pneg %p1554_p9 }
  0x23   : > { %p1561_p13 = por %p1560_p12, %p1559_p11 }
  0x25   : > { %p1562_p1 = pnand %p1561_p13, %p1555_p10 }
  0x27   : > { %1565 = shalt.err (!%p1562_p1)
}
  0x28   : > { %s1781_s10 = smov 256   ;;  %s1782_s30 = smov 128  }
  0x29   : > { %s1783_s12 = smov 8   ;;  %p291_p4 = scmp.lt.s32.totalorder %s1778_s28, 5 }
  0x2a   : > { %1380 = dma.hbm_to_vmem [thread:$0]  (!%p1901_p5), %s242_s11, 2048, %s244_s13, %s1906_s15, %s1781_s10, %s1782_s30, %s1783_s12  }
  0x2b   : > { %p1919_p8 = pnand %p1241_p6, %p291_p4  ;;  %s1924_s17 = sadd.s32 4294967295, %s1778_s28  }
  0x2c   : > { %s1226_s8 = sadd.s32 4294967294, %s1778_s28   ;;  %s36_s9 = sadd.s32 1, %s1770_s26 }
  0x2d   : > { %s39_s7 = sadd.s32 1, %s1774_s27  ;;  %p37_p9 = scmp.ge.s32.totalorder %s36_s9, 2 }
  0x2e   : > { %s46_s11 = sadd.s32 1, %s1758_s23  ;;  %p53_p10 = scmp.ne.s32.totalorder %s1758_s23, %s1754_s22 }
  0x2f   : > { %p59_p11 = scmp.ne.s32.totalorder %s1754_s22, %s1750_s21  ;;  %s2311_s9 = smov (%p37_p9, %s36_s9), 0 }
  0x30   : > { %2273 = sst [smem:[#allocation21_spill]] %s2311_s9  ;;  %s2313_s7 = smov (!%p37_p9, %s39_s7), %s1774_s27 }
  0x31   : > { %p1942_p6 = por %p54_p0, %p53_p10  ;;  %p60_p12 = scmp.eq.s32.totalorder %s1924_s17, 0 }
  0x32   : > { %p41_p13 = scmp.ge.s32.totalorder %s2313_s7, 2  ;;  %s69_s10 = ssub.s32 %s1770_s26, %s2311_s9 }
  0x33   : > { %p1952_p1 = por %p60_p12, %p59_p11  ;;  %p70_p4 = scmp.eq.s32.totalorder %s69_s10, 0 }
  0x34   : > { %s2315_s7 = smov (%p41_p13, %s2313_s7), 0  ;;  %p1968_p0 = por %p85_p2, %p60_p12 }
  0x35   : > { %2276 = sst [smem:[#allocation22_spill]] %s2315_s7  ;;  %s43_s1 = ssub.s32 %s1774_s27, %s2315_s7 }
  0x36   : > { %s1961_s12 = scalar_select %p70_p4, %s1746_s20, %s72_s29  }
  0x37   : > { %p44_p9 = scmp.eq.s32.totalorder %s43_s1, 0  ;;  %p182_p7 = scmp.eq.s32.totalorder %s1924_s17, 3 }
  0x38   : > { %2277 = sst [smem:[#allocation23_spill]] %s1961_s12  ;;  %p188_p3 = scmp.eq.s32.totalorder %s1226_s8, 3 }
  0x39   : > { %s211_s9 = sand.u32 1, %s1758_s23   ;;  %p1980_p13 = por %p182_p7, %p53_p10 }
  0x3a   : > { %s1975_s10 = scalar_select %p44_p9, %s1758_s23, %s46_s11  }
  0x3b   : > { %s2280_s25 = scalar_select %p1980_p13, 1, 0 }
  0x3c   : > { %2279 = sst [smem:[#allocation24_spill]] %s1975_s10  ;;  %p1987_p4 = por %p188_p3, %p59_p11 }
  0x3d   : > { %s1229_s18 = sshll.u32 %s211_s9, 6  ;;  %s1295_s7 = sshll.u32 %s1774_s27, 10 }
  0x3e   : > { %s2281_s29 = scalar_select %p1987_p4, 1, 0 }
  0x3f   : > { %s2283_s0 = sld [smem:[#allocation26_spill]]  ;;  %s215_s8 = scalar_lea.vmem [#allocation3], %s1229_s18 }
  0x40   : > { %2282 = sst [smem:[#allocation25_spill]] %s2281_s29  ;;  %s222_s4 = sshll.u32 %s215_s8, 4  ;;  %s223_s4 = int_to_ptr.vmem [resolvable:$true] %s222_s4 }
  0x41   : > { %p2284_p2 = scmp.lt.s32.totalorder %s1778_s28, 4  ;;  %s1235_s10 = sshll.u32 %s1890_s6, 1 }
  0x42   : > { %s212_s23 = scalar_lea.sflag [#allocation4], %s211_s9  ;;  %s1579_s29 = scalar_lea.vmem %s223_s4, 1024 }
  0x43   : > { %p1999_p7 = pnand %p2284_p2, %p1942_p6  ;;  %p1580_p10 = scmp.ne.s32.totalorder %s223_s4, %s1579_s29 }
  0x44   : > { %s1784_s20 = smov [#allocation3]  }
  0x45   : > { %s221_s1 = scalar_lea.hbm %s2283_s0, %s1295_s7  ;;  %p1568_p3 = pneg %p1999_p7 }
  0x46   : > { %s1584_s7 = sshll.u32 %s1784_s20, 4  ;;  %s1585_s7 = int_to_ptr.vmem [resolvable:$false] %s1584_s7 }
  0x47   : > { %p1582_p11 = pnand %p1580_p10, %p1568_p3  ;;  %s1586_s12 = scalar_lea.vmem %s1585_s7, 2048 }
  0x48   : > { %p1587_p9 = scmp.lt.s32.totalorder %s223_s4, %s1585_s7  ;;  %p1588_p4 = scmp.lt.s32.totalorder %s1586_s12, %s1579_s29 }
  0x49   : > { %p1583_p12 = pneg %p1582_p11 }
  0x4a   : > { %p1589_p13 = por %p1588_p4, %p1587_p9 }
  0x4c   : > { %p1590_p6 = pnand %p1589_p13, %p1583_p12 }
  0x4e   : > { %1593 = shalt.err (!%p1590_p6)
}
  0x4f   : > { %s1785_s13 = smov 64   ;;  %s1786_s9 = smov 4  }
  0x50   : > { %1377 = dma.hbm_to_vmem [thread:$0]  (!%p1999_p7), %s221_s1, 1024, %s223_s4, %s212_s23, %s1785_s13, %s1785_s13, %s1786_s9  }
  0x51   : > { %s1297_s18 = sshll.u32 %s1770_s26, 5  ;;  %s257_s7 = scalar_lea.vmem [#allocation8], %s1235_s10 }
  0x52   : > { %s263_s0 = scalar_lea.hbm %s2245_s2, %s1297_s18  ;;  %s265_s29 = sshll.u32 %s257_s7, 4  ;;  %s266_s29 = int_to_ptr.vmem [resolvable:$true] %s265_s29 }
  0x53   : > { %s1607_s12 = scalar_lea.vmem %s266_s29, 32  ;;  %p2286_p4 = pneg %p1901_p5 }
  0x54   : > { %p1608_p13 = scmp.ne.s32.totalorder %s266_s29, %s1607_s12  ;;  %s1787_s27 = smov [#allocation8]  }
  0x55   : > { %s1612_s11 = sshll.u32 %s1787_s27, 4  ;;  %s1613_s11 = int_to_ptr.vmem [resolvable:$false] %s1612_s11 }
  0x56   : > { %p1610_p2 = pnand %p1608_p13, %p2286_p4  ;;  %s1614_s21 = scalar_lea.vmem %s1613_s11, 64 }
  0x57   : > { %p1615_p10 = scmp.lt.s32.totalorder %s266_s29, %s1613_s11  ;;  %p1616_p7 = scmp.lt.s32.totalorder %s1614_s21, %s1607_s12 }
  0x58   : > { %p1611_p3 = pneg %p1610_p2 }
  0x59   : > { %p1617_p11 = por %p1616_p7, %p1615_p10 }
  0x5b   : > { %p1618_p12 = pnand %p1617_p11, %p1611_p3 }
  0x5d   : > { %1621 = shalt.err (!%p1618_p12)
}
  0x5e   : > { %1383 = dma.hbm_to_vmem [thread:$0]  (!%p1901_p5), %s263_s0, 32, %s266_s29, %s1906_s15  }
  0x5f   : > { %s1298_s4 = sshll.u32 %s1770_s26, 11  ;;  %s2287_s1 = sshll.u32 %s1890_s6, 7 }
  0x60   : > { %s282_s27 = scalar_lea.hbm %s2246_s3, %s1298_s4  ;;  %s276_s18 = scalar_lea.vmem [#allocation9], %s2287_s1 }
  0x61   : > { %s283_s8 = sshll.u32 %s276_s18, 4  ;;  %s273_s21 = scalar_lea.sflag [#allocation10], %s1890_s6  ;;  %s284_s8 = int_to_ptr.vmem [resolvable:$true] %s283_s8 }
  0x62   : > { %s1635_s20 = scalar_lea.vmem %s284_s8, 2048  ;;  %p2288_p6 = pmov %p2286_p4 }
  0x63   : > { %p1636_p9 = scmp.ne.s32.totalorder %s284_s8, %s1635_s20  ;;  %s1788_s7 = smov [#allocation9]  }
  0x64   : > { %s1640_s12 = sshll.u32 %s1788_s7, 4  ;;  %s1641_s12 = int_to_ptr.vmem [resolvable:$false] %s1640_s12 }
  0x65   : > { %p1638_p13 = pnand %p1636_p9, %p2288_p6  ;;  %s1642_s0 = scalar_lea.vmem %s1641_s12, 4096 }
  0x66   : > { %p1643_p2 = scmp.lt.s32.totalorder %s284_s8, %s1641_s12  ;;  %p1644_p3 = scmp.lt.s32.totalorder %s1642_s0, %s1635_s20 }
  0x67   : > { %p1639_p4 = pneg %p1638_p13 }
  0x68   : > { %p1645_p10 = por %p1644_p3, %p1643_p2 }
  0x6a   : > { %p1646_p7 = pnand %p1645_p10, %p1639_p4 }
  0x6c   : > { %1649 = shalt.err (!%p1646_p7)
}
  0x6d   : > { %1386 = dma.hbm_to_vmem [thread:$0]  (!%p1901_p5), %s282_s27, 2048, %s284_s8, %s273_s21, %s1785_s13, %s1785_s13, %s1786_s9  }
  0x6e   : > { %295 = sbr.rel (%p1919_p8) target bundleno = 676 (0x2a4), region = 40  ;;  %s2039_s6 = sand.u32 (!%p1919_p8), 1, %s1754_s22  }
  0x6f   : > { %s1242_s15 = sshll.u32 (!%p1919_p8), %s2039_s6, 6  ;;  %s298_s29 = scalar_lea.sflag (!%p1919_p8), [#allocation4], %s2039_s6 }
  0x70   : > { %s2043_s11 = scalar_lea.vmem (!%p1919_p8), [#allocation3], %s1242_s15 }
  0x73   : > { %1721 = dma.done.wait (%p1952_p1), %s298_s29, 1024  }
  0x74   : > { %1723 = vsyncadd (%p1952_p1), %s298_s29, 4294966272  ;;  %s306_s14 = sand.u32 1, %s1924_s17   ;;  %s308_s16 = sand.u32 1, %s1742_s19  }
  0x75   : > { %s1243_s13 = sshll.u32 %s308_s16, 7  ;;  %s307_s9 = scalar_lea.sflag [#allocation7], %s306_s14 }
  0x76   : > { %s2051_s4 = scalar_lea.vmem [#allocation6], %s1243_s13 }
  0x77   : > { %1725 = dma.done.wait (%p1968_p0), %s307_s9, 2080  }
  0x78   : > { %1727 = vsyncadd (%p1968_p0), %s307_s9, 4294965216  ;;  %s1244_s23 = sshll.u32 %s308_s16, 1  ;;  %s325_s30 = scalar_lea.sflag [#allocation10], %s308_s16 }
  0x79   : > { %s2057_s10 = scalar_lea.vmem [#allocation8], %s1244_s23  ;;  %s2059_s27 = scalar_lea.vmem [#allocation9], %s1243_s13 }
  0x7a   : > { %1729 = dma.done.wait (%p1968_p0), %s325_s30, 2048  }
  0x7b   : > { %1731 = vsyncadd (%p1968_p0), %s325_s30, 4294965248  ;;  %s1246_s17 = sshll.u32 %s2039_s6, 7  ;;  %p1247_p5 = scmp.ne.s32.totalorder %s1762_s24, 0 }
  0x7c   : > { %s2066_s1 = scalar_lea.vmem [#allocation11], %s1246_s17 }
  0x7d   : > { %379 = sbr.rel (%p1247_p5) target bundleno = 139 (0x8b), region = 60 }
  0x82   : > { %v1789_v0 = vmov 0.0  }
  0x83   : > { %380 = vst [vmem:[#allocation2 + $0x30] sm:$0xff] %v1789_v0  ;;  %381 = vst [vmem:[#allocation2] sm:$0xff] %v1789_v0 }
  0x84   : > { %382 = vst [vmem:[#allocation2 + $0x58] sm:$0xff] %v1789_v0  ;;  %383 = vst [vmem:[#allocation2 + $0x18] sm:$0xff] %v1789_v0 }
  0x85   : > { %384 = vst [vmem:[#allocation2 + $0x50] sm:$0xff] %v1789_v0  ;;  %385 = vst [vmem:[#allocation2 + $0x68] sm:$0xff] %v1789_v0 }
  0x86   : > { %386 = vst [vmem:[#allocation2 + $0x8] sm:$0xff] %v1789_v0  ;;  %387 = vst [vmem:[#allocation2 + $0x48] sm:$0xff] %v1789_v0 }
  0x87   : > { %388 = vst [vmem:[#allocation2 + $0x40] sm:$0xff] %v1789_v0  ;;  %389 = vst [vmem:[#allocation2 + $0x20] sm:$0xff] %v1789_v0 }
  0x88   : > { %390 = vst [vmem:[#allocation2 + $0x10] sm:$0xff] %v1789_v0  ;;  %391 = vst [vmem:[#allocation2 + $0x38] sm:$0xff] %v1789_v0 }
  0x89   : > { %392 = vst [vmem:[#allocation2 + $0x60] sm:$0xff] %v1789_v0  ;;  %393 = vst [vmem:[#allocation2 + $0x70] sm:$0xff] %v1789_v0 }
  0x8a   : > { %394 = vst [vmem:[#allocation2 + $0x78] sm:$0xff] %v1789_v0  ;;  %395 = vst [vmem:[#allocation2 + $0x28] sm:$0xff] %v1789_v0 }
  0x8b PF: > { %v1490_v1 = vld [vmem:[%s2051_s4 + $0x74] ss:$8 sps:$4 sm:$0xff]   ;;  %v1492_v2 = vld [vmem:[%s2051_s4 + $0x70] ss:$8 sps:$4 sm:$0xff]   ;;  %v1790_v3 = vmov 0   ;;  %v1528_v24 = vld [vmem:[%s2059_s27 + $0x60] sm:$0xff]   ;;  %v430_v42 = vlaneseq }
  0x8c   : > { %600 = vmatprep.mubr.bf16.mxu0 %v1790_v3  ;;  %568 = vmatprep.subr.bf16.mxu0 %v1490_v1  ;;  %v1493_v4 = vld [vmem:[%s2051_s4 + $0x64] ss:$8 sps:$4 sm:$0xff]   ;;  %v1495_v5 = vld [vmem:[%s2051_s4 + $0x60] ss:$8 sps:$4 sm:$0xff]   ;;  %v1496_v6 = vld [vmem:[%s2051_s4 + $0x54] ss:$8 sps:$4 sm:$0xff]  }
  0x8d   : > { %569 = vmatpush1.bf16.msra.mxu0 %v1492_v2  ;;  %v1498_v7 = vld [vmem:[%s2051_s4 + $0x50] ss:$8 sps:$4 sm:$0xff]   ;;  %v1499_v8 = vld [vmem:[%s2051_s4 + $0x44] ss:$8 sps:$4 sm:$0xff]   ;;  %v1501_v9 = vld [vmem:[%s2051_s4 + $0x40] ss:$8 sps:$4 sm:$0xff]  }
  0x8e   : > { %570 = vmatprep.subr.bf16.mxu0 %v1493_v4  ;;  %v1502_v10 = vld [vmem:[%s2051_s4 + $0x34] ss:$8 sps:$4 sm:$0xff]   ;;  %v1504_v11 = vld [vmem:[%s2051_s4 + $0x30] ss:$8 sps:$4 sm:$0xff]   ;;  %v1505_v12 = vld [vmem:[%s2051_s4 + $0x24] ss:$8 sps:$4 sm:$0xff]  }
  0x8f   : > { %v1507_v13 = vld [vmem:[%s2051_s4 + $0x20] ss:$8 sps:$4 sm:$0xff]   ;;  %v1508_v14 = vld [vmem:[%s2051_s4 + $0x14] ss:$8 sps:$4 sm:$0xff]   ;;  %v1510_v17 = vld [vmem:[%s2051_s4 + $0x10] ss:$8 sps:$4 sm:$0xff]  }
  0x90   : > { %v1522_v15 = vld [vmem:[%s2059_s27 + $0x78] sm:$0xff]   ;;  %v1524_v18 = vld [vmem:[%s2059_s27 + $0x70] sm:$0xff]   ;;  %v1526_v20 = vld [vmem:[%s2059_s27 + $0x68] sm:$0xff]   ;;  %v431_v43 = vshrl.u32 %v430_v42, 7  ;;  %p1288_p8 = scmp.ne.s32.totalorder %s1762_s24, 1 }
  0x91   : > { %571 = vmatpush1.bf16.msra.mxu0 %v1495_v5  ;;  %v1523_v16 = vld [vmem:[%s2059_s27 + $0x38] sm:$0xff]   ;;  %1300 = vmatprep.subr.bf16.mxu1 %v1522_v15  ;;  %v1525_v19 = vld [vmem:[%s2059_s27 + $0x30] sm:$0xff]   ;;  %v1511_v21 = vld [vmem:[%s2051_s4 + $0x4] ss:$8 sps:$4 sm:$0xff]   ;;  %s2289_s8 = sld [smem:[#allocation28_spill]] (!%p1288_p8) }
  0x92   : > { %572 = vmatprep.subr.bf16.mxu0 %v1496_v6  ;;  %1301 = vmatpush3.bf16.msra.mxu1 %v1523_v16  ;;  %v1513_v22 = vld [vmem:[%s2051_s4] ss:$8 sps:$4 sm:$0xff]   ;;  %v1527_v23 = vld [vmem:[%s2059_s27 + $0x28] sm:$0xff]   ;;  %v1517_v31 = vld [vmem:[%s2043_s11 + $0x18] sm:$0xff]   ;;  %v436_v44 = vsub.s32 1, %v431_v43  ;;  %v432_v45 = vsub.s32 0, %v431_v43 }
  0x93   : > { %1302 = vmatprep.subr.bf16.mxu1 %v1524_v18  ;;  %v1514_v25 = vld [vmem:[%s2043_s11] sm:$0xff]   ;;  %v1515_v29 = vld [vmem:[%s2043_s11 + $0x8] sm:$0xff]   ;;  %v1516_v30 = vld [vmem:[%s2043_s11 + $0x10] sm:$0xff]  }
  0x94   : > { %v1529_v26 = vld [vmem:[%s2059_s27 + $0x20] sm:$0xff]   ;;  %v1530_v27 = vld [vmem:[%s2059_s27 + $0x58] sm:$0xff]   ;;  %v1520_v34 = vld [vmem:[%s2043_s11 + $0x30] sm:$0xff]  }
  0x95   : > { %573 = vmatpush1.bf16.msra.mxu0 %v1498_v7  ;;  %v1531_v28 = vld [vmem:[%s2059_s27 + $0x18] sm:$0xff]   ;;  %v1519_v33 = vld [vmem:[%s2043_s11 + $0x28] sm:$0xff]   ;;  %v1532_v36 = vld [vmem:[%s2059_s27 + $0x50] sm:$0xff]  }
  0x96   : > { %574 = vmatprep.subr.bf16.mxu0 %v1499_v8  ;;  %1303 = vmatpush3.bf16.msra.mxu1 %v1525_v19  ;;  %v1518_v32 = vld [vmem:[%s2043_s11 + $0x20] sm:$0xff]   ;;  %v1521_v35 = vld [vmem:[%s2043_s11 + $0x38] sm:$0xff]   ;;  %v1534_v38 = vld [vmem:[%s2059_s27 + $0x48] sm:$0xff]  }
  0x97   : > { %1304 = vmatprep.subr.bf16.mxu1 %v1526_v20  ;;  %v1533_v37 = vld [vmem:[%s2059_s27 + $0x10] sm:$0xff]   ;;  %v1535_v39 = vld [vmem:[%s2059_s27 + $0x8] sm:$0xff]   ;;  %v1536_v40 = vld [vmem:[%s2059_s27 + $0x40] sm:$0xff]  }
  0x98   : > { %v1537_v41 = vld [vmem:[%s2059_s27] sm:$0xff]   ;;  %v428_v46 = vld [vmem:[%s2057_s10] sm:$0x3] }
  0x99   : > { %575 = vmatpush1.bf16.msra.mxu0 %v1501_v9  ;;  %v2118_v48 = vrot.slane %v428_v46, %v436_v44  ;;  %v2120_v49 = vrot.slane %v428_v46, %v432_v45 }
  0x9a   : > { %576 = vmatprep.subr.bf16.mxu0 %v1502_v10  ;;  %1305 = vmatpush3.bf16.msra.mxu1 %v1527_v23 }
  0x9b   : > { %1306 = vmatprep.subr.bf16.mxu1 %v1528_v24 }
  0x9d   : > { %577 = vmatpush1.bf16.msra.mxu0 %v1504_v11 }
  0x9e   : > { %578 = vmatprep.subr.bf16.mxu0 %v1505_v12  ;;  %1307 = vmatpush3.bf16.msra.mxu1 %v1529_v26 }
  0x9f   : > { %1308 = vmatprep.subr.bf16.mxu1 %v1530_v27 }
  0xa1   : > { %579 = vmatpush1.bf16.msra.mxu0 %v1507_v13 }
  0xa2   : > { %580 = vmatprep.subr.bf16.mxu0 %v1508_v14  ;;  %1309 = vmatpush3.bf16.msra.mxu1 %v1531_v28 }
  0xa3   : > { %1310 = vmatprep.subr.bf16.mxu1 %v1532_v36 }
  0xa5   : > { %581 = vmatpush1.bf16.msra.mxu0 %v1510_v17 }
  0xa6   : > { %582 = vmatprep.subr.bf16.mxu0 %v1511_v21  ;;  %1311 = vmatpush3.bf16.msra.mxu1 %v1533_v37 }
  0xa7   : > { %1312 = vmatprep.subr.bf16.mxu1 %v1534_v38 }
  0xa9   : > { %583 = vmatpush1.bf16.msra.mxu0 %v1513_v22 }
  0xaa   : > { %1313 = vmatpush3.bf16.msra.mxu1 %v1535_v39 }
  0xab   : > { %1314 = vmatprep.subr.bf16.mxu1 %v1536_v40 }
  0xac   : > { %601 = vmatmul.mubr.bf16.vlgmr.msra.gmra.mxu0 %v1514_v25 }
  0xad   : > { %610 = vmatprep.mubr.bf16.mxu0 %v1790_v3 }
  0xae   : > { %1315 = vmatpush3.bf16.msra.mxu1 %v1537_v41 }
  0xb4   : > { %611 = vmatmul.mubr.bf16.gmra.mxu0 %v1515_v29 }
  0xb5   : > { %620 = vmatprep.mubr.bf16.mxu0 %v1790_v3 }
  0xbc   : > { %621 = vmatmul.mubr.bf16.gmra.mxu0 %v1516_v30 }
  0xbd   : > { %630 = vmatprep.mubr.bf16.mxu0 %v1790_v3 }
  0xc4   : > { %631 = vmatmul.mubr.bf16.gmra.mxu0 %v1517_v31 }
  0xc5   : > { %640 = vmatprep.mubr.bf16.mxu0 %v1790_v3 }
  0xcc   : > { %641 = vmatmul.mubr.bf16.gmra.mxu0 %v1518_v32 }
  0xcd   : > { %650 = vmatprep.mubr.bf16.mxu0 %v1790_v3 }
  0xd4   : > { %651 = vmatmul.mubr.bf16.gmra.mxu0 %v1519_v33 }
  0xd5   : > { %660 = vmatprep.mubr.bf16.mxu0 %v1790_v3 }
  0xdc   : > { %661 = vmatmul.mubr.bf16.gmra.mxu0 %v1520_v34 }
  0xdd   : > { %670 = vmatprep.mubr.bf16.mxu0 %v1790_v3 }
  0xe4   : > { %671 = vmatmul.mubr.bf16.gmra.mxu0 %v1521_v35 }
 0x16c   : > { %v602_v47 = vpop.f32.mrf.mxu0 }
 0x16d   : > { %v603_v54 = vadd.f32 %v602_v47, %v2120_v49 }
 0x16e   : > { %v604_v50 = vpop.f32.mrf.mxu0 }
 0x16f   : > { %v605_v52 = vadd.f32 %v604_v50, %v2118_v48  ;;  %v681_v61 = vmax.f32 %v603_v54, 0.0 }
 0x170   : > { %v606_v51 = vpop.f32.mrf.mxu0 }
 0x171   : > { %v607_v53 = vadd.f32 %v606_v51, %v2120_v49  ;;  %v682_v59 = vmax.f32 %v605_v52, 0.0 }
 0x172   : > { %v608_v55 = vpop.f32.mrf.mxu0 }
 0x173   : > { %v609_v56 = vadd.f32 %v608_v55, %v2118_v48  ;;  %v683_v57 = vmax.f32 %v607_v53, 0.0 }
 0x174   : > { %v612_v58 = vpop.f32.mrf.mxu0 }
 0x175   : > { %v684_v60 = vmax.f32 %v609_v56, 0.0  ;;  %v729_v0 = vpack.c.bf16 %v683_v57, %v681_v61  ;;  %v613_v4 = vadd.f32 %v612_v58, %v2120_v49 }
 0x176   : > { %v614_v62 = vpop.f32.mrf.mxu0 }
 0x177   : > { %v730_v63 = vpack.c.bf16 %v684_v60, %v682_v59  ;;  %v615_v2 = vadd.f32 %v614_v62, %v2118_v48  ;;  %v685_v11 = vmax.f32 %v613_v4, 0.0 }
 0x178   : > { %v616_v1 = vpop.f32.mrf.mxu0 }
 0x179   : > { %v617_v3 = vadd.f32 %v616_v1, %v2120_v49  ;;  %905 = vmatprep.mubr.bf16.mxu1 %v730_v63  ;;  %v686_v9 = vmax.f32 %v615_v2, 0.0 }
 0x17a   : > { %v618_v5 = vpop.f32.mrf.mxu0  ;;  %906 = vmatmul.mubr.bf16.vlgmr.msra.gmra.mxu1 %v729_v0 }
 0x17b   : > { %v619_v6 = vadd.f32 %v618_v5, %v2118_v48  ;;  %v687_v7 = vmax.f32 %v617_v3, 0.0 }
 0x17c   : > { %v622_v8 = vpop.f32.mrf.mxu0 }
 0x17d   : > { %v688_v10 = vmax.f32 %v619_v6, 0.0  ;;  %v731_v14 = vpack.c.bf16 %v687_v7, %v685_v11  ;;  %v623_v18 = vadd.f32 %v622_v8, %v2120_v49 }
 0x17e   : > { %v624_v12 = vpop.f32.mrf.mxu0 }
 0x17f   : > { %v732_v13 = vpack.c.bf16 %v688_v10, %v686_v9  ;;  %v625_v16 = vadd.f32 %v624_v12, %v2118_v48  ;;  %v689_v25 = vmax.f32 %v623_v18, 0.0 }
 0x180   : > { %v626_v15 = vpop.f32.mrf.mxu0 }
 0x181   : > { %v627_v17 = vadd.f32 %v626_v15, %v2120_v49  ;;  %913 = vmatprep.mubr.bf16.mxu1 %v732_v13  ;;  %v690_v23 = vmax.f32 %v625_v16, 0.0 }
 0x182   : > { %v628_v19 = vpop.f32.mrf.mxu0  ;;  %914 = vmatmul.mubr.bf16.gmra.mxu1 %v731_v14 }
 0x183   : > { %v629_v20 = vadd.f32 %v628_v19, %v2118_v48  ;;  %v691_v21 = vmax.f32 %v627_v17, 0.0 }
 0x184   : > { %v632_v22 = vpop.f32.mrf.mxu0 }
 0x185   : > { %v692_v24 = vmax.f32 %v629_v20, 0.0  ;;  %v733_v28 = vpack.c.bf16 %v691_v21, %v689_v25  ;;  %v633_v32 = vadd.f32 %v632_v22, %v2120_v49 }
 0x186   : > { %v634_v26 = vpop.f32.mrf.mxu0 }
 0x187   : > { %v734_v27 = vpack.c.bf16 %v692_v24, %v690_v23  ;;  %v635_v30 = vadd.f32 %v634_v26, %v2118_v48  ;;  %v693_v39 = vmax.f32 %v633_v32, 0.0 }
 0x188   : > { %v636_v29 = vpop.f32.mrf.mxu0 }
 0x189   : > { %v637_v31 = vadd.f32 %v636_v29, %v2120_v49  ;;  %921 = vmatprep.mubr.bf16.mxu1 %v734_v27  ;;  %v694_v37 = vmax.f32 %v635_v30, 0.0 }
 0x18a   : > { %v638_v33 = vpop.f32.mrf.mxu0  ;;  %922 = vmatmul.mubr.bf16.gmra.mxu1 %v733_v28 }
 0x18b   : > { %v639_v34 = vadd.f32 %v638_v33, %v2118_v48  ;;  %v695_v35 = vmax.f32 %v637_v31, 0.0 }
 0x18c   : > { %v642_v36 = vpop.f32.mrf.mxu0 }
 0x18d   : > { %v696_v38 = vmax.f32 %v639_v34, 0.0  ;;  %v735_v42 = vpack.c.bf16 %v695_v35, %v693_v39  ;;  %v643_v46 = vadd.f32 %v642_v36, %v2120_v49  ;;  %v713_v36 = vld [vmem:[#allocation2 + $0x30] sm:$0xff] }
 0x18e   : > { %v644_v40 = vpop.f32.mrf.mxu0 }
 0x18f   : > { %v736_v41 = vpack.c.bf16 %v696_v38, %v694_v37  ;;  %v645_v44 = vadd.f32 %v644_v40, %v2118_v48  ;;  %v697_v55 = vmax.f32 %v643_v46, 0.0 }
 0x190   : > { %v646_v43 = vpop.f32.mrf.mxu0 }
 0x191   : > { %v647_v45 = vadd.f32 %v646_v43, %v2120_v49  ;;  %929 = vmatprep.mubr.bf16.mxu1 %v736_v41  ;;  %v698_v53 = vmax.f32 %v645_v44, 0.0  ;;  %v714_v41 = vld [vmem:[#allocation2] sm:$0xff]  ;;  %v715_v44 = vld [vmem:[#allocation2 + $0x58] sm:$0xff] }
 0x192   : > { %v648_v47 = vpop.f32.mrf.mxu0  ;;  %930 = vmatmul.mubr.bf16.gmra.mxu1 %v735_v42 }
 0x193   : > { %v649_v50 = vadd.f32 %v648_v47, %v2118_v48  ;;  %v699_v51 = vmax.f32 %v647_v45, 0.0 }
 0x194   : > { %v652_v52 = vpop.f32.mrf.mxu0 }
 0x195   : > { %v700_v54 = vmax.f32 %v649_v50, 0.0  ;;  %v737_v58 = vpack.c.bf16 %v699_v51, %v697_v55  ;;  %v653_v62 = vadd.f32 %v652_v52, %v2120_v49  ;;  %v716_v51 = vld [vmem:[#allocation2 + $0x18] sm:$0xff] }
 0x196   : > { %v654_v56 = vpop.f32.mrf.mxu0 }
 0x197   : > { %v738_v57 = vpack.c.bf16 %v700_v54, %v698_v53  ;;  %v655_v60 = vadd.f32 %v654_v56, %v2118_v48  ;;  %v701_v5 = vmax.f32 %v653_v62, 0.0  ;;  %v717_v56 = vld [vmem:[#allocation2 + $0x50] sm:$0xff] }
 0x198   : > { %v656_v59 = vpop.f32.mrf.mxu0 }
 0x199   : > { %v657_v61 = vadd.f32 %v656_v59, %v2120_v49  ;;  %937 = vmatprep.mubr.bf16.mxu1 %v738_v57  ;;  %v702_v3 = vmax.f32 %v655_v60, 0.0 }
 0x19a   : > { %v658_v63 = vpop.f32.mrf.mxu0  ;;  %938 = vmatmul.mubr.bf16.gmra.mxu1 %v737_v58 }
 0x19b   : > { %v659_v0 = vadd.f32 %v658_v63, %v2118_v48  ;;  %v703_v1 = vmax.f32 %v657_v61, 0.0  ;;  %v718_v61 = vld [vmem:[#allocation2 + $0x68] sm:$0xff] }
 0x19c   : > { %v662_v2 = vpop.f32.mrf.mxu0 }
 0x19d   : > { %v704_v4 = vmax.f32 %v659_v0, 0.0  ;;  %v739_v8 = vpack.c.bf16 %v703_v1, %v701_v5  ;;  %v663_v12 = vadd.f32 %v662_v2, %v2120_v49  ;;  %v719_v2 = vld [vmem:[#allocation2 + $0x8] sm:$0xff] }
 0x19e   : > { %v664_v6 = vpop.f32.mrf.mxu0 }
 0x19f   : > { %v740_v7 = vpack.c.bf16 %v704_v4, %v702_v3  ;;  %v665_v10 = vadd.f32 %v664_v6, %v2118_v48  ;;  %v705_v19 = vmax.f32 %v663_v12, 0.0  ;;  %v721_v12 = vld [vmem:[#allocation2 + $0x40] sm:$0xff] }
 0x1a0   : > { %v666_v9 = vpop.f32.mrf.mxu0 }
 0x1a1   : > { %v667_v11 = vadd.f32 %v666_v9, %v2120_v49  ;;  %945 = vmatprep.mubr.bf16.mxu1 %v740_v7  ;;  %v706_v17 = vmax.f32 %v665_v10, 0.0  ;;  %v720_v7 = vld [vmem:[#allocation2 + $0x48] sm:$0xff] }
 0x1a2   : > { %v668_v13 = vpop.f32.mrf.mxu0  ;;  %946 = vmatmul.mubr.bf16.gmra.mxu1 %v739_v8 }
 0x1a3   : > { %v669_v14 = vadd.f32 %v668_v13, %v2118_v48  ;;  %v707_v15 = vmax.f32 %v667_v11, 0.0 }
 0x1a4   : > { %v672_v16 = vpop.f32.mrf.mxu0 }
 0x1a5   : > { %v708_v18 = vmax.f32 %v669_v14, 0.0  ;;  %v741_v22 = vpack.c.bf16 %v707_v15, %v705_v19  ;;  %v673_v26 = vadd.f32 %v672_v16, %v2120_v49 }
 0x1a6   : > { %v674_v20 = vpop.f32.mrf.mxu0 }
 0x1a7   : > { %v742_v21 = vpack.c.bf16 %v708_v18, %v706_v17  ;;  %v675_v24 = vadd.f32 %v674_v20, %v2118_v48  ;;  %v709_v32 = vmax.f32 %v673_v26, 0.0  ;;  %v722_v17 = vld [vmem:[#allocation2 + $0x20] sm:$0xff] }
 0x1a8   : > { %v676_v23 = vpop.f32.mrf.mxu0 }
 0x1a9   : > { %v677_v25 = vadd.f32 %v676_v23, %v2120_v49  ;;  %953 = vmatprep.mubr.bf16.mxu1 %v742_v21  ;;  %v710_v30 = vmax.f32 %v675_v24, 0.0 }
 0x1aa   : > { %v678_v27 = vpop.f32.mrf.mxu0  ;;  %954 = vmatmul.mubr.bf16.gmra.mxu1 %v741_v22  ;;  %v723_v22 = vld [vmem:[#allocation2 + $0x10] sm:$0xff] }
 0x1ab   : > { %v679_v28 = vadd.f32 %v678_v27, %v2118_v48  ;;  %v711_v29 = vmax.f32 %v677_v25, 0.0  ;;  %v724_v27 = vld [vmem:[#allocation2 + $0x38] sm:$0xff] }
 0x1ad   : > { %v712_v31 = vmax.f32 %v679_v28, 0.0  ;;  %v743_v34 = vpack.c.bf16 %v711_v29, %v709_v32  ;;  %v725_v32 = vld [vmem:[#allocation2 + $0x60] sm:$0xff] }
 0x1af   : > { %v744_v33 = vpack.c.bf16 %v712_v31, %v710_v30 }
 0x1b1   : > { %961 = vmatprep.mubr.bf16.mxu1 %v744_v33 }
 0x1b2   : > { %962 = vmatmul.mubr.bf16.gmra.mxu1 %v743_v34 }
 0x23a   : > { %v1316_v35 = vpop.f32.mrf.mxu1 }
 0x23c   : > { %v1317_v37 = vpop.f32.mrf.mxu1 }
 0x23d   : > { %v1318_v38 = vadd.f32 %v1317_v37, %v1316_v35  ;;  %v726_v37 = vld [vmem:[#allocation2 + $0x70] sm:$0xff] }
 0x23e   : > { %v1319_v39 = vpop.f32.mrf.mxu1 }
 0x23f   : > { %v970_v40 = vadd.f32 %v1318_v38, %v713_v36 }
 0x240   : > { %v1320_v49 = vpop.f32.mrf.mxu1 }
 0x241   : > { %986 = vst [vmem:[#allocation2 + $0x30] sm:$0xff] %v970_v40  ;;  %v1321_v42 = vadd.f32 %v1320_v49, %v1319_v39  ;;  %v727_v49 = vld [vmem:[#allocation2 + $0x78] sm:$0xff] }
 0x242   : > { %v1322_v43 = vpop.f32.mrf.mxu1 }
 0x243   : > { %v971_v48 = vadd.f32 %v1321_v42, %v714_v41 }
 0x244   : > { %v1323_v45 = vpop.f32.mrf.mxu1 }
 0x245   : > { %987 = vst [vmem:[#allocation2] sm:$0xff] %v971_v48  ;;  %v1324_v46 = vadd.f32 %v1323_v45, %v1322_v43  ;;  %v728_v45 = vld [vmem:[#allocation2 + $0x28] sm:$0xff] }
 0x246   : > { %v1325_v47 = vpop.f32.mrf.mxu1 }
 0x247   : > { %v972_v50 = vadd.f32 %v1324_v46, %v715_v44 }
 0x248   : > { %v1326_v52 = vpop.f32.mrf.mxu1 }
 0x249   : > { %988 = vst [vmem:[#allocation2 + $0x58] sm:$0xff] %v972_v50  ;;  %v1327_v53 = vadd.f32 %v1326_v52, %v1325_v47 }
 0x24a   : > { %v1328_v54 = vpop.f32.mrf.mxu1 }
 0x24b   : > { %v973_v55 = vadd.f32 %v1327_v53, %v716_v51 }
 0x24c   : > { %v1329_v57 = vpop.f32.mrf.mxu1 }
 0x24d   : > { %989 = vst [vmem:[#allocation2 + $0x18] sm:$0xff] %v973_v55  ;;  %v1330_v58 = vadd.f32 %v1329_v57, %v1328_v54 }
 0x24e   : > { %v1331_v59 = vpop.f32.mrf.mxu1 }
 0x24f   : > { %v974_v60 = vadd.f32 %v1330_v58, %v717_v56 }
 0x250   : > { %v1332_v62 = vpop.f32.mrf.mxu1 }
 0x251   : > { %990 = vst [vmem:[#allocation2 + $0x50] sm:$0xff] %v974_v60  ;;  %v1333_v63 = vadd.f32 %v1332_v62, %v1331_v59 }
 0x252   : > { %v1334_v0 = vpop.f32.mrf.mxu1 }
 0x253   : > { %v975_v1 = vadd.f32 %v1333_v63, %v718_v61 }
 0x254   : > { %v1335_v3 = vpop.f32.mrf.mxu1 }
 0x255   : > { %991 = vst [vmem:[#allocation2 + $0x68] sm:$0xff] %v975_v1  ;;  %v1336_v4 = vadd.f32 %v1335_v3, %v1334_v0 }
 0x256   : > { %v1337_v5 = vpop.f32.mrf.mxu1 }
 0x257   : > { %v976_v6 = vadd.f32 %v1336_v4, %v719_v2 }
 0x258   : > { %v1338_v8 = vpop.f32.mrf.mxu1 }
 0x259   : > { %992 = vst [vmem:[#allocation2 + $0x8] sm:$0xff] %v976_v6  ;;  %v1339_v9 = vadd.f32 %v1338_v8, %v1337_v5 }
 0x25a   : > { %v1340_v10 = vpop.f32.mrf.mxu1 }
 0x25b   : > { %v977_v11 = vadd.f32 %v1339_v9, %v720_v7 }
 0x25c   : > { %v1341_v13 = vpop.f32.mrf.mxu1 }
 0x25d   : > { %993 = vst [vmem:[#allocation2 + $0x48] sm:$0xff] %v977_v11  ;;  %v1342_v14 = vadd.f32 %v1341_v13, %v1340_v10 }
 0x25e   : > { %v1343_v15 = vpop.f32.mrf.mxu1 }
 0x25f   : > { %v978_v16 = vadd.f32 %v1342_v14, %v721_v12 }
 0x260   : > { %v1344_v18 = vpop.f32.mrf.mxu1 }
 0x261   : > { %994 = vst [vmem:[#allocation2 + $0x40] sm:$0xff] %v978_v16  ;;  %v1345_v19 = vadd.f32 %v1344_v18, %v1343_v15 }
 0x262   : > { %v1346_v20 = vpop.f32.mrf.mxu1 }
 0x263   : > { %v979_v21 = vadd.f32 %v1345_v19, %v722_v17 }
 0x264   : > { %v1347_v23 = vpop.f32.mrf.mxu1 }
 0x265   : > { %995 = vst [vmem:[#allocation2 + $0x20] sm:$0xff] %v979_v21  ;;  %v1348_v24 = vadd.f32 %v1347_v23, %v1346_v20 }
 0x266   : > { %v1349_v25 = vpop.f32.mrf.mxu1 }
 0x267   : > { %v980_v26 = vadd.f32 %v1348_v24, %v723_v22 }
 0x268   : > { %v1350_v28 = vpop.f32.mrf.mxu1 }
 0x269   : > { %996 = vst [vmem:[#allocation2 + $0x10] sm:$0xff] %v980_v26  ;;  %v1351_v29 = vadd.f32 %v1350_v28, %v1349_v25 }
 0x26a   : > { %v1352_v30 = vpop.f32.mrf.mxu1 }
 0x26b   : > { %v981_v31 = vadd.f32 %v1351_v29, %v724_v27 }
 0x26c   : > { %v1353_v33 = vpop.f32.mrf.mxu1 }
 0x26d   : > { %997 = vst [vmem:[#allocation2 + $0x38] sm:$0xff] %v981_v31  ;;  %v1354_v34 = vadd.f32 %v1353_v33, %v1352_v30 }
 0x26e   : > { %v1355_v35 = vpop.f32.mrf.mxu1 }
 0x26f   : > { %v982_v36 = vadd.f32 %v1354_v34, %v725_v32 }
 0x270   : > { %v1356_v38 = vpop.f32.mrf.mxu1 }
 0x271   : > { %998 = vst [vmem:[#allocation2 + $0x60] sm:$0xff] %v982_v36  ;;  %v1357_v39 = vadd.f32 %v1356_v38, %v1355_v35 }
 0x272   : > { %v1358_v40 = vpop.f32.mrf.mxu1 }
 0x273   : > { %v983_v41 = vadd.f32 %v1357_v39, %v726_v37 }
 0x274   : > { %v1359_v42 = vpop.f32.mrf.mxu1 }
 0x275   : > { %999 = vst [vmem:[#allocation2 + $0x70] sm:$0xff] %v983_v41  ;;  %v1360_v43 = vadd.f32 %v1359_v42, %v1358_v40 }
 0x276   : > { %v1361_v48 = vpop.f32.mrf.mxu1 }
 0x277   : > { %v984_v44 = vadd.f32 %v1360_v43, %v727_v49 }
 0x278   : > { %v1362_v46 = vpop.f32.mrf.mxu1 }
 0x279   : > { %1000 = vst [vmem:[#allocation2 + $0x78] sm:$0xff] %v984_v44  ;;  %v1363_v47 = vadd.f32 %v1362_v46, %v1361_v48  ;;  %1005 = sbr.rel (%p1288_p8) target bundleno = 649 (0x289), region = 64 }
 0x27b   : > { %v985_v50 = vadd.f32 %v1363_v47, %v728_v45 }
 0x27d   : > { %1001 = vst [vmem:[#allocation2 + $0x28] sm:$0xff] %v985_v50 }
 0x27e   : > { %v1006_v51 = vld [vmem:[#allocation2 + $0x30] sm:$0xff]  ;;  %v1289_v52 = vld [vmem:[%s2289_s8] ss:$0 sm:$0xff]  ;;  %v1008_v56 = vld [vmem:[#allocation2 + $0x58] sm:$0xff] }
 0x27f   : > { %v1007_v53 = vld [vmem:[#allocation2] sm:$0xff]  ;;  %v1029_v54 = vadd.f32 %v1289_v52, %v1006_v51  ;;  %v1009_v57 = vld [vmem:[#allocation2 + $0x18] sm:$0xff]  ;;  %v1010_v58 = vld [vmem:[#allocation2 + $0x50] sm:$0xff]  ;;  %v1031_v59 = vadd.f32 %v1289_v52, %v1008_v56 }
 0x280   : > { %v1030_v55 = vadd.f32 %v1289_v52, %v1007_v53  ;;  %v1032_v60 = vadd.f32 %v1289_v52, %v1009_v57  ;;  %v1033_v61 = vadd.f32 %v1289_v52, %v1010_v58  ;;  %v1011_v62 = vld [vmem:[#allocation2 + $0x68] sm:$0xff]  ;;  %v1014_v4 = vld [vmem:[#allocation2 + $0x40] sm:$0xff]  ;;  %v1016_v6 = vld [vmem:[#allocation2 + $0x10] sm:$0xff] }
 0x281   : > { %v1012_v63 = vld [vmem:[#allocation2 + $0x8] sm:$0xff]  ;;  %1045 = vst [vmem:[%s2066_s1] sm:$0xff] %v1029_v54  ;;  %v1034_v1 = vadd.f32 %v1289_v52, %v1011_v62  ;;  %v1015_v5 = vld [vmem:[#allocation2 + $0x20] sm:$0xff]  ;;  %1047 = vst [vmem:[%s2066_s1 + $0x10] sm:$0xff] %v1031_v59  ;;  %v1037_v7 = vadd.f32 %v1289_v52, %v1014_v4  ;;  %v1039_v9 = vadd.f32 %v1289_v52, %v1016_v6 }
 0x282   : > { %v1013_v0 = vld [vmem:[#allocation2 + $0x48] sm:$0xff]  ;;  %1046 = vst [vmem:[%s2066_s1 + $0x8] sm:$0xff] %v1030_v55  ;;  %v1035_v2 = vadd.f32 %v1289_v52, %v1012_v63  ;;  %1048 = vst [vmem:[%s2066_s1 + $0x18] sm:$0xff] %v1032_v60  ;;  %v1038_v8 = vadd.f32 %v1289_v52, %v1015_v5  ;;  %v1017_v10 = vld [vmem:[#allocation2 + $0x38] sm:$0xff] }
 0x283   : > { %v1036_v3 = vadd.f32 %v1289_v52, %v1013_v0  ;;  %1049 = vst [vmem:[%s2066_s1 + $0x20] sm:$0xff] %v1033_v61  ;;  %v1018_v11 = vld [vmem:[#allocation2 + $0x60] sm:$0xff]  ;;  %v1019_v12 = vld [vmem:[#allocation2 + $0x70] sm:$0xff]  ;;  %1050 = vst [vmem:[%s2066_s1 + $0x28] sm:$0xff] %v1034_v1  ;;  %v1040_v13 = vadd.f32 %v1289_v52, %v1017_v10 }
 0x284   : > { %1051 = vst [vmem:[%s2066_s1 + $0x30] sm:$0xff] %v1035_v2  ;;  %v1041_v14 = vadd.f32 %v1289_v52, %v1018_v11  ;;  %v1042_v15 = vadd.f32 %v1289_v52, %v1019_v12  ;;  %v1020_v16 = vld [vmem:[#allocation2 + $0x78] sm:$0xff]  ;;  %v1021_v17 = vld [vmem:[#allocation2 + $0x28] sm:$0xff]  ;;  %1053 = vst [vmem:[%s2066_s1 + $0x40] sm:$0xff] %v1037_v7 }
 0x285   : > { %1052 = vst [vmem:[%s2066_s1 + $0x38] sm:$0xff] %v1036_v3  ;;  %1054 = vst [vmem:[%s2066_s1 + $0x48] sm:$0xff] %v1038_v8  ;;  %v1043_v18 = vadd.f32 %v1289_v52, %v1020_v16  ;;  %v1044_v19 = vadd.f32 %v1289_v52, %v1021_v17 }
 0x286   : > { %1055 = vst [vmem:[%s2066_s1 + $0x50] sm:$0xff] %v1039_v9  ;;  %1056 = vst [vmem:[%s2066_s1 + $0x58] sm:$0xff] %v1040_v13 }
 0x287   : > { %1057 = vst [vmem:[%s2066_s1 + $0x60] sm:$0xff] %v1041_v14  ;;  %1058 = vst [vmem:[%s2066_s1 + $0x68] sm:$0xff] %v1042_v15 }
 0x288   : > { %1059 = vst [vmem:[%s2066_s1 + $0x70] sm:$0xff] %v1043_v18  ;;  %1060 = vst [vmem:[%s2066_s1 + $0x78] sm:$0xff] %v1044_v19 }
 0x289 PF: > { %s2290_s24 = sld [smem:[#allocation19_spill]]  ;;  %s1075_s15 = sshll.u32 %s2066_s1, 4  ;;  %s2181_s15 = int_to_ptr.vmem [resolvable:$true] %s1075_s15 }
 0x28a   : > { %s2291_s12 = sld [smem:[#allocation29_spill]]  ;;  %s1062_s29 = scalar_lea.sflag [#allocation5], %s2039_s6 }
 0x28b   : > { %s1650_s11 = scalar_lea.vmem %s2181_s15, 2048  ;;  %p2292_p0 = scmp.ne.s32.totalorder %s2280_s25, 0 }
 0x28c   : > { %p1651_p1 = scmp.ne.s32.totalorder %s2181_s15, %s1650_s11  ;;  %s1791_s14 = smov [#allocation11]  }
 0x28d   : > { %s1654_s16 = sshll.u32 %s1791_s14, 4  ;;  %s1655_s16 = int_to_ptr.vmem [resolvable:$false] %s1654_s16 }
 0x28e   : > { %p1652_p11 = pnand %p1651_p1, %p2292_p0  ;;  %s1656_s13 = scalar_lea.vmem %s1655_s16, 4096 }
 0x28f   : > { %s1299_s21 = sshll.u32 %s2290_s24, 11  ;;  %p1657_p9 = scmp.lt.s32.totalorder %s2181_s15, %s1655_s16 }
 0x290   : > { %s2178_s0 = scalar_lea.hbm %s2291_s12, %s1299_s21  ;;  %p1653_p12 = pneg %p1652_p11 }
 0x291   : > { %p1658_p6 = scmp.lt.s32.totalorder %s1656_s13, %s1650_s11 }
 0x293   : > { %p1659_p13 = por %p1658_p6, %p1657_p9 }
 0x295   : > { %p1660_p4 = pnand %p1659_p13, %p1653_p12 }
 0x297   : > { %1663 = shalt.err (!%p1660_p4)
}
 0x298   : > { %s1664_s9 = scalar_lea.hbm %s2178_s0, 2048  ;;  %s1668_s10 = scalar_lea.hbm %s2291_s12, 4096 }
 0x299   : > { %p1665_p2 = scmp.ne.s32.totalorder %s2178_s0, %s1664_s9  ;;  %p1669_p7 = scmp.lt.s32.totalorder %s2178_s0, %s2291_s12 }
 0x29a   : > { %p1670_p5 = scmp.lt.s32.totalorder %s1668_s10, %s1664_s9 }
 0x29b   : > { %p1666_p3 = pnand %p1665_p2, %p2292_p0 }
 0x29c   : > { %p1671_p8 = por %p1670_p5, %p1669_p7 }
 0x29d   : > { %p1667_p10 = pneg %p1666_p3 }
 0x29f   : > { %p1672_p1 = pnand %p1671_p8, %p1667_p10 }
 0x2a1   : > { %1675 = shalt.err (!%p1672_p1)
}
 0x2a2   : > { %s1792_s17 = smov 128   ;;  %s1793_s1 = smov 8  }
 0x2a3   : > { %1372 = dma.vmem_to_hbm [thread:$0]  (%p2292_p0), %s2181_s15, 2048, %s2178_s0, %s1062_s29, %s1792_s17, %s1792_s17, %s1793_s1  }
 0x2a4 PF: > { %s2293_s5 = sld [smem:[#allocation17_spill]]  ;;  %p1392_p11 = scmp.ge.s32.totalorder %s1778_s28, 2 }
 0x2a5   : > { %s2294_s18 = sld [smem:[#allocation25_spill]] }
 0x2aa   : > { %s1090_s8 = sand.u32 1, %s2293_s5  }
 0x2ab   : > { %p2295_p12 = scmp.ne.s32.totalorder %s2294_s18, 0  ;;  %s1091_s24 = scalar_lea.sflag [#allocation5], %s1090_s8 }
 0x2ad   : > { %p1388_p9 = pnand %p1392_p11, %p2295_p12 }
 0x2af   : > { %p1389_p6 = pneg %p1388_p9 }
 0x2b1   : > { %1733 = dma.done.wait (%p1389_p6), %s1091_s24, 2048  }
 0x2b2   : > { %1735 = vsyncadd (%p1389_p6), %s1091_s24, 4294965248  ;;  %s27_s28 = sadd.s32 1, %s1778_s28   ;;  %s2296_s21 = sld [smem:[#allocation16_spill]] }
 0x2b3   : > { %p24_p13 = scmp.ge.s32.totalorder %s27_s28, 6   ;;  %s2297_s20 = sld [smem:[#allocation23_spill]] }
 0x2b4   : > { %s2298_s25 = sld [smem:[#allocation18_spill]]  ;;  %s2303_s18 = smov %s1742_s19 }
 0x2b5   : > { %s2299_s23 = sld [smem:[#allocation24_spill]]  ;;  %s2307_s24 = smov %s1770_s26 }
 0x2b6   : > { %s2300_s6 = sld [smem:[#allocation20_spill]] }
 0x2b7   : > { %s2301_s7 = sld [smem:[#allocation21_spill]] }
 0x2b8   : > { %s2302_s27 = sld [smem:[#allocation22_spill]]  ;;  %s2304_s19 = smov %s2296_s21 }
 0x2b9   : > { %s2305_s21 = smov %s1754_s22  ;;  %26 = sbr.rel (!%p24_p13) target bundleno = 18 (0x12), region = 130 }
 0x2ba   : > { %s2306_s22 = smov %s2298_s25 }
 0x2bc   : > { %s2308_s25 = smov %s2300_s6 }
 0x2bd   : > { %s2309_s26 = smov %s2301_s7 }
 0x2be   :  { %1096 = vsyncpa [#allocation4], 1 }
 0x2bf   :  { %1098 = vsyncpa [#allocation4 + $0x1], 1 }
 0x2c0   :  { %1099 = vsyncpa [#allocation7], 1 }
 0x2c1   :  { %1101 = vsyncpa [#allocation7 + $0x1], 1 }
 0x2c2   :  { %1102 = vsyncpa [#allocation10], 1 }
 0x2c3   :  { %1104 = vsyncpa [#allocation10 + $0x1], 1 }
 0x2c4   :  { %1105 = vsyncpa [#allocation5], 1 }
 0x2c5   :  { %1107 = vsyncpa [#allocation5 + $0x1], 1 }

</bundles_post_ra>
